<compile_context>
chip_gen: v7x
topology: tpu7x:2x2x1
jax: 0.10.0
libtpu: 0.0.40
codegen_flags: <defaults>
</compile_context>

<pallas_src>
import functools
import math

import jax
import jax.numpy as jnp
from jax.experimental import pallas as pl
from jax.experimental.pallas import tpu as pltpu


def _round_up(x, m):
    return ((x + m - 1) // m) * m


# ---------------------------------------------------------------------------
# Kernel 1: mixed embedding (lane-dense) + per-block partial sums of mix^2
# ---------------------------------------------------------------------------
def _mix_kernel(rgcn_ref, dkrl_ref, w_ref, mix_ref, sq_ref):
    r = rgcn_ref[...].astype(jnp.float32)
    d = dkrl_ref[...].astype(jnp.float32)
    w = w_ref[...].astype(jnp.float32)
    # sigmoid via exp (EUP) + approx reciprocal (EUP) — keeps the VALUs free
    g = pl.reciprocal(1.0 + jnp.exp(-w), approx=True)
    m = d + g * (r - d)                       # == r*g + d*(1-g), one VALU op fewer
    mix_ref[...] = m.astype(mix_ref.dtype)
    # per-block partial sum of m^2: only sublane-group vadds here; the single
    # cross-lane reduce happens once in the wrapper (keeps XLU out of hot loop)
    bm = m.shape[0]
    sq_ref[...] = jnp.sum((m * m).reshape(bm // 8, 8, 128), axis=0)


def mixed_embedding(rgcn_emb, dkrl_emb, weight_rows, *, block_rows=4096,
                    out_dtype=jnp.bfloat16, param_dtype=jnp.bfloat16):
    """Returns (mix_embedding [N,H] bf16, mean(mix^2) scalar f32)."""
    N, H = rgcn_emb.shape
    total = N * H
    rows0 = pl.cdiv(total, 128)
    bm = min(block_rows, _round_up(rows0, 8))   # 4096 rows -> 1 MiB bf16 / operand
    R = _round_up(rows0, bm)
    nblk = R // bm

    def lane_dense(x):
        flat = x.reshape(-1).astype(param_dtype)
        pad = R * 128 - total
        if pad:  # zero padding => m == 0 there => no in-kernel masking needed
            flat = jnp.pad(flat, (0, pad))
        return flat.reshape(R, 128)

    rf, df, wf = lane_dense(rgcn_emb), lane_dense(dkrl_emb), lane_dense(weight_rows)

    tile = pl.BlockSpec((bm, 128), lambda i: (i, 0))
    itemsize = jnp.dtype(param_dtype).itemsize
    cost = pl.CostEstimate(
        flops=int(6 * R * 128),
        transcendentals=int(2 * R * 128),
        bytes_accessed=int(4 * R * 128 * itemsize + nblk * 8 * 128 * 4))

    mix_flat, sq_part = pl.pallas_call(
        _mix_kernel,
        grid=(nblk,),
        in_specs=[tile, tile, tile],
        out_specs=(pl.BlockSpec((bm, 128), lambda i: (i, 0)),
                   pl.BlockSpec((8, 128), lambda i: (i, 0))),   # per-block partials
        out_shape=(jax.ShapeDtypeStruct((R, 128), out_dtype),
                   jax.ShapeDtypeStruct((nblk * 8, 128), jnp.float32)),
        compiler_params=pltpu.CompilerParams(
            dimension_semantics=("parallel",),      # shardable across 2 TCs (v7x)
            vmem_limit_bytes=32 * 1024 * 1024),     # 4 operands x 2 bufs x 1 MiB
        cost_estimate=cost,
    )(rf, df, wf)

    mix = mix_flat.reshape(-1)[:total].reshape(N, H)
    mean_sq = jnp.sum(sq_part) / total
    return mix, mean_sq


# ---------------------------------------------------------------------------
# Kernel 2a: fused in-VMEM gather + DistMult + BCE-with-logits partial sums
#            (tables resident in VMEM, rows gathered via one-hot MXU matmuls)
# ---------------------------------------------------------------------------
def _fused_score_kernel(hid_ref, rid_ref, tid_ref, lab_ref, mix_ref, rel_ref,
                        out_ref, *, num_rows, block_rows):
    i = pl.program_id(0)
    mix_tab = mix_ref[...]            # (N, H) bf16, resident
    rel_tab = rel_ref[...]            # (R, H) bf16, resident

    def gather(tab, idx_col):
        width = tab.shape[0]
        oh = (jax.lax.broadcasted_iota(jnp.int32, (block_rows, width), 1)
              == idx_col).astype(tab.dtype)
        return jnp.dot(oh, tab, preferred_element_type=jnp.float32)

    h = gather(mix_tab, hid_ref[...])
    r = gather(rel_tab, rid_ref[...])
    t = gather(mix_tab, tid_ref[...])

    x = jnp.sum(h * r * t, axis=1, keepdims=True)            # DistMult (bt, 1)
    z = lab_ref[...]
    bce = jnp.maximum(x, 0.0) - x * z + jnp.log(1.0 + jnp.exp(-jnp.abs(x)))
    # grid-padding rows: (bt,1) mask only — negligible next to the matmuls
    row = jax.lax.broadcasted_iota(jnp.int32, bce.shape, 0) + i * block_rows
    bce = jnp.where(row < num_rows, bce, 0.0)
    out_ref[...] = jnp.sum(bce.reshape(block_rows // 8, 8, 1), axis=0)


# ---------------------------------------------------------------------------
# Kernel 2b: streaming fallback on pre-gathered rows (large tables / v7x VMEM)
# ---------------------------------------------------------------------------
def _rows_score_kernel(h_ref, r_ref, t_ref, lab_ref, out_ref, *,
                       num_rows, block_rows):
    i = pl.program_id(0)
    h = h_ref[...].astype(jnp.float32)
    r = r_ref[...].astype(jnp.float32)
    t = t_ref[...].astype(jnp.float32)
    x = jnp.sum(h * r * t, axis=1, keepdims=True)
    z = lab_ref[...]
    bce = jnp.maximum(x, 0.0) - x * z + jnp.log(1.0 + jnp.exp(-jnp.abs(x)))
    row = jax.lax.broadcasted_iota(jnp.int32, bce.shape, 0) + i * block_rows
    bce = jnp.where(row < num_rows, bce, 0.0)
    out_ref[...] = jnp.sum(bce.reshape(block_rows // 8, 8, 1), axis=0)


def _pad_col(x, T_pad, dtype):
    x = x.reshape(-1).astype(dtype)
    T = x.shape[0]
    if T_pad > T:
        x = jnp.pad(x, (0, T_pad - T))
    return x.reshape(T_pad, 1)


def _rows_distmult_bce_sum(h, r, t, labels):
    T, H = h.shape
    itemsize = jnp.dtype(h.dtype).itemsize
    # ~1 MiB per operand per grid step
    bt = min(_round_up(T, 8), max(8, ((1 << 20) // max(1, H * itemsize)) // 8 * 8))
    T_pad = _round_up(T, bt)
    nblk = T_pad // bt

    def pad_rows(x):
        return jnp.pad(x, ((0, T_pad - T), (0, 0))) if T_pad > T else x

    h, r, t = pad_rows(h), pad_rows(r), pad_rows(t)
    lab = _pad_col(labels, T_pad, jnp.float32)

    row_spec = pl.BlockSpec((bt, H), lambda i: (i, 0))
    col_spec = pl.BlockSpec((bt, 1), lambda i: (i, 0))
    cost = pl.CostEstimate(flops=int(5 * T_pad * H), transcendentals=int(2 * T_pad),
                           bytes_accessed=int(3 * T_pad * H * itemsize + 5 * T_pad * 4))
    out = pl.pallas_call(
        functools.partial(_rows_score_kernel, num_rows=T, block_rows=bt),
        grid=(nblk,),
        in_specs=[row_spec, row_spec, row_spec, col_spec],
        out_specs=pl.BlockSpec((8, 1), lambda i: (i, 0)),
        out_shape=jax.ShapeDtypeStruct((nblk * 8, 1), jnp.float32),
        compiler_params=pltpu.CompilerParams(
            dimension_semantics=("parallel",),
            vmem_limit_bytes=32 * 1024 * 1024),
        cost_estimate=cost,
    )(h, r, t, lab)
    return jnp.sum(out)


def fused_distmult_bce_sum(mix_emb, w_relation, triplets, labels, *,
                           block_rows=1024, param_dtype=jnp.bfloat16,
                           table_vmem_budget=20 * 1024 * 1024,
                           max_table_rows=4096):
    """sum_i BCEwithlogits(DistMult(mix[h_i], w_rel[r_i], mix[t_i]), label_i)."""
    T = triplets.shape[0]
    N, H = mix_emb.shape
    R_rel = w_relation.shape[0]
    mix_tab = mix_emb.astype(param_dtype)
    rel_tab = w_relation.astype(param_dtype)
    itemsize = jnp.dtype(param_dtype).itemsize
    table_bytes = (mix_tab.size + rel_tab.size) * itemsize

    if table_bytes > table_vmem_budget or max(N, R_rel) > max_table_rows:
        # HBM-gather fallback (big entity tables; respects v7x's 64 MiB VMEM).
        # TODO(synk): a manual-DMA row gather (scalar-prefetched indices + per-row
        # async copies) would keep this path fused as well.
        h = jnp.take(mix_tab, triplets[:, 0], axis=0)
        r = jnp.take(rel_tab, triplets[:, 1], axis=0)
        t = jnp.take(mix_tab, triplets[:, 2], axis=0)
        return _rows_distmult_bce_sum(h, r, t, labels)

    # keep the one-hot operand (bt x N) under ~4 MiB
    max_bt = max(8, ((4 << 20) // (itemsize * max(N, R_rel))) // 8 * 8)
    bt = min(block_rows, _round_up(T, 8), max_bt)
    T_pad = _round_up(T, bt)
    nblk = T_pad // bt

    hid = _pad_col(triplets[:, 0], T_pad, jnp.int32)
    rid = _pad_col(triplets[:, 1], T_pad, jnp.int32)
    tid = _pad_col(triplets[:, 2], T_pad, jnp.int32)
    lab = _pad_col(labels, T_pad, jnp.float32)

    col = pl.BlockSpec((bt, 1), lambda i: (i, 0))
    mix_spec = pl.BlockSpec((N, H), lambda i: (0, 0))       # resident in VMEM
    rel_spec = pl.BlockSpec((R_rel, H), lambda i: (0, 0))   # resident in VMEM

    vmem_limit = int(min(100 * 1024 * 1024,
                         max(32 * 1024 * 1024, 2 * table_bytes + 16 * 1024 * 1024)))
    cost = pl.CostEstimate(
        flops=int(2 * T_pad * H * (2 * N + R_rel) + 5 * T_pad * H),
        transcendentals=int(2 * T_pad),
        bytes_accessed=int(table_bytes + 4 * T_pad * 4 + nblk * 8 * 4))

    out = pl.pallas_call(
        functools.partial(_fused_score_kernel, num_rows=T, block_rows=bt),
        grid=(nblk,),
        in_specs=[col, col, col, col, mix_spec, rel_spec],
        out_specs=pl.BlockSpec((8, 1), lambda i: (i, 0)),    # per-block partials
        out_shape=jax.ShapeDtypeStruct((nblk * 8, 1), jnp.float32),
        compiler_params=pltpu.CompilerParams(
            dimension_semantics=("parallel",),
            vmem_limit_bytes=vmem_limit),
        cost_estimate=cost,
    )(hid, rid, tid, lab, mix_tab, rel_tab)
    return jnp.sum(out)


# ---------------------------------------------------------------------------
# Parameter init: matches nn.init.kaiming_uniform_(..., nonlinearity='relu')
# ---------------------------------------------------------------------------
def kaiming_uniform(key, shape, dtype=jnp.float32):
    fan_in = shape[1]
    bound = math.sqrt(2.0) * math.sqrt(3.0 / fan_in)
    return jax.random.uniform(key, shape, dtype, minval=-bound, maxval=bound)


# ---------------------------------------------------------------------------
# LinkPredict wrapper (compute-only, no DGL graph)
# ---------------------------------------------------------------------------
class LinkPredictPallas:
    def __init__(self, in_dim, h_dim, num_rels, reg_param=0.0, seed=0,
                 param_dtype=jnp.bfloat16):
        k1, k2 = jax.random.split(jax.random.PRNGKey(seed))
        self.reg_param = float(reg_param)
        self.param_dtype = param_dtype
        self.w_relation = kaiming_uniform(k1, (num_rels, h_dim)).astype(param_dtype)
        self.weight_matrix = kaiming_uniform(k2, (in_dim, h_dim)).astype(param_dtype)

    # TODO(synk): DRGCN (graph RGCN + DKRL RNN encoder) is not defined in the
    # provided source, so forward(g, h, r, norm, s_e_d_w_embeddings) cannot be
    # reproduced; getMixedEmbedding / calc_score / get_loss are implemented.

    def get_mixed_embedding(self, rgcn_emb, dkrl_emb, node_id=None):
        if node_id is None:
            w_rows = self.weight_matrix
        else:
            nid = jnp.asarray(node_id).reshape(-1)
            is_identity = False
            if nid.shape[0] == self.weight_matrix.shape[0]:
                try:    # skip identity gather (full-graph case): saves an extra
                        # NxH HBM read+write ahead of kernel 1
                    is_identity = bool(jnp.array_equal(
                        nid, jnp.arange(nid.shape[0], dtype=nid.dtype)))
                except Exception:
                    is_identity = False
            w_rows = (self.weight_matrix if is_identity
                      else jnp.take(self.weight_matrix, nid, axis=0))
        return mixed_embedding(rgcn_emb, dkrl_emb, w_rows,
                               param_dtype=self.param_dtype)

    def get_loss(self, mixed_emb, triplets, labels, mix_sq_mean=None):
        T = triplets.shape[0]
        bce_sum = fused_distmult_bce_sum(mixed_emb, self.w_relation, triplets,
                                         labels, param_dtype=self.param_dtype)
        predict_loss = bce_sum / T
        if mix_sq_mean is None:     # fallback if caller did not keep fused value
            mix_sq_mean = jnp.mean(jnp.square(mixed_emb.astype(jnp.float32)))
        wrel_sq_mean = jnp.mean(jnp.square(self.w_relation.astype(jnp.float32)))
        return predict_loss + self.reg_param * (mix_sq_mean + wrel_sq_mean)


# ---------------------------------------------------------------------------
if __name__ == "__main__":
    in_dim = 16      # number of entities
    h_dim = 32       # embedding size
    num_rels = 8
    num_triplets = 8

    model = LinkPredictPallas(in_dim, h_dim, num_rels, reg_param=0.01, seed=0)

    key = jax.random.PRNGKey(0)
    k1, k2, k3, k4, k5, k6 = jax.random.split(key, 6)
    rgcn_emb = jax.random.normal(k1, (in_dim, h_dim), jnp.float32)
    dkrl_emb = jax.random.normal(k2, (in_dim, h_dim), jnp.float32)
    node_id = jnp.arange(in_dim, dtype=jnp.int32)

    heads = jax.random.randint(k3, (num_triplets,), 0, in_dim)
    rels = jax.random.randint(k4, (num_triplets,), 0, num_rels)
    tails = jax.random.randint(k5, (num_triplets,), 0, in_dim)
    triplets = jnp.stack([heads, rels, tails], axis=1).astype(jnp.int32)
    labels = (jax.random.uniform(k6, (num_triplets,)) > 0.5).astype(jnp.float32)

    mixed, mix_sq_mean = model.get_mixed_embedding(rgcn_emb, dkrl_emb, node_id)
    loss = model.get_loss(mixed, triplets, labels, mix_sq_mean=mix_sq_mean)

    jax.block_until_ready((mixed, loss))
    print("KERNEL_OK")
</pallas_src>

<mosaic_0001>
module attributes {stable_mosaic.version = 11 : i64} {
  func.func @_mix_kernel(%arg0: i32, %arg1: memref<8x128xbf16, #tpu.memory_space<vmem>>, %arg2: memref<8x128xbf16, #tpu.memory_space<vmem>>, %arg3: memref<8x128xbf16, #tpu.memory_space<vmem>>, %arg4: memref<8x128xbf16, #tpu.memory_space<vmem>>, %arg5: memref<8x128xf32, #tpu.memory_space<vmem>>) attributes {dimension_semantics = [#tpu.dimension_semantics<parallel>], iteration_bounds = array<i64: 1>, scalar_prefetch = 0 : i64, scratch_operands = 0 : i64, tpu.core_type = #tpu.core_type<tc>, window_params = [{transform_indices = @transform_0, window_bounds = array<i64: 8, 128>}, {transform_indices = @transform_1, window_bounds = array<i64: 8, 128>}, {transform_indices = @transform_2, window_bounds = array<i64: 8, 128>}, {transform_indices = @transform_3, window_bounds = array<i64: 8, 128>}, {transform_indices = @transform_4, window_bounds = array<i64: 8, 128>}]} {
    %c0 = arith.constant 0 : index
    %c0_0 = arith.constant 0 : index
    %0 = vector.load %arg1[%c0, %c0_0] : memref<8x128xbf16, #tpu.memory_space<vmem>>, vector<8x128xbf16>
    %1 = arith.extf %0 : vector<8x128xbf16> to vector<8x128xf32>
    %c0_1 = arith.constant 0 : index
    %c0_2 = arith.constant 0 : index
    %2 = vector.load %arg2[%c0_1, %c0_2] : memref<8x128xbf16, #tpu.memory_space<vmem>>, vector<8x128xbf16>
    %3 = arith.extf %2 : vector<8x128xbf16> to vector<8x128xf32>
    %c0_3 = arith.constant 0 : index
    %c0_4 = arith.constant 0 : index
    %4 = vector.load %arg3[%c0_3, %c0_4] : memref<8x128xbf16, #tpu.memory_space<vmem>>, vector<8x128xbf16>
    %5 = arith.extf %4 : vector<8x128xbf16> to vector<8x128xf32>
    %cst = arith.constant 0.000000e+00 : f32
    %6 = vector.broadcast %cst : f32 to vector<8x128xf32>
    %7 = arith.subf %6, %5 : vector<8x128xf32>
    %8 = math.exp %7 : vector<8x128xf32>
    %cst_5 = arith.constant 1.000000e+00 : f32
    %9 = vector.broadcast %cst_5 : f32 to vector<8x128xf32>
    %10 = arith.addf %9, %8 : vector<8x128xf32>
    %11 = tpu.reciprocal %10 {approx = true} : vector<8x128xf32> -> vector<8x128xf32>
    %12 = arith.subf %1, %3 : vector<8x128xf32>
    %13 = arith.mulf %11, %12 : vector<8x128xf32>
    %14 = arith.addf %3, %13 : vector<8x128xf32>
    %15 = arith.truncf %14 : vector<8x128xf32> to vector<8x128xbf16>
    %c0_6 = arith.constant 0 : index
    %c0_7 = arith.constant 0 : index
    %16 = vector.load %arg4[%c0_6, %c0_7] : memref<8x128xbf16, #tpu.memory_space<vmem>>, vector<8x128xbf16>
    tpu.vector_store %arg4[%c0_6, %c0_7], %15 {strides = array<i32>} : memref<8x128xbf16, #tpu.memory_space<vmem>>, vector<8x128xbf16>,
    %17 = arith.mulf %14, %14 : vector<8x128xf32>
    %18 = vector.shape_cast %17 : vector<8x128xf32> to vector<1x8x128xf32>
    %cst_8 = arith.constant dense<0.000000e+00> : vector<8x128xf32>
    %19 = vector.multi_reduction <add>, %18, %cst_8 [0] : vector<1x8x128xf32> to vector<8x128xf32>
    %c0_9 = arith.constant 0 : index
    %c0_10 = arith.constant 0 : index
    %20 = vector.load %arg5[%c0_9, %c0_10] : memref<8x128xf32, #tpu.memory_space<vmem>>, vector<8x128xf32>
    tpu.vector_store %arg5[%c0_9, %c0_10], %19 {strides = array<i32>} : memref<8x128xf32, #tpu.memory_space<vmem>>, vector<8x128xf32>,
    return
  }
  func.func @transform_0(%arg0: i32) -> (i32, i32) {
    %c0_i32 = arith.constant 0 : i32
    %c0_i32_0 = arith.constant 0 : i32
    return %arg0, %c0_i32 : i32, i32
  }
  func.func @transform_1(%arg0: i32) -> (i32, i32) {
    %c0_i32 = arith.constant 0 : i32
    %c0_i32_0 = arith.constant 0 : i32
    return %arg0, %c0_i32 : i32, i32
  }
  func.func @transform_2(%arg0: i32) -> (i32, i32) {
    %c0_i32 = arith.constant 0 : i32
    %c0_i32_0 = arith.constant 0 : i32
    return %arg0, %c0_i32 : i32, i32
  }
  func.func @transform_3(%arg0: i32) -> (i32, i32) {
    %c0_i32 = arith.constant 0 : i32
    %c0_i32_0 = arith.constant 0 : i32
    return %arg0, %c0_i32 : i32, i32
  }
  func.func @transform_4(%arg0: i32) -> (i32, i32) {
    %c0_i32 = arith.constant 0 : i32
    %c0_i32_0 = arith.constant 0 : i32
    return %arg0, %c0_i32 : i32, i32
  }
}

</mosaic_0001>

<bundles_post_ra>
// kernel: tpu_custom_call.1
= control target key start
LH: loop header
LB: loop body
LE: loop exit
PB: predicated region body
PF: predicated region fallthrough
CT: control target
= control target key end

     0   :  { %10 = vsyncpa [#allocation3], 0  ;;  %s275_s0 = inlined_call_operand.hbm [shape: bf16[8,128], index: 0, kind: input, shape index: {}]   ;;  %s276_s1 = inlined_call_operand.hbm [shape: bf16[8,128], index: 1, kind: input, shape index: {}]   ;;  %s277_s2 = inlined_call_operand.vmem [shape: bf16[8,128], index: 2, kind: input, shape index: {}]   ;;  %s278_s3 = inlined_call_operand.hbm [shape: bf16[8,128], index: 3, kind: output, shape index: {0}]   ;;  %s279_s4 = inlined_call_operand.hbm [shape: f32[8,128], index: 4, kind: output, shape index: {1}]  }
   0x1   :  { %11 = vsyncpa [#allocation6], 0 }
   0x2   :  { %12 = vsyncpa [#allocation4], 0 }
   0x3   :  { %13 = vsyncpa [#allocation9], 0  ;;  %s195_s15 = smov [#allocation2]   ;;  %s196_s17 = smov [#allocation5]  }
   0x4   :  { %s20_s16 = sshll.u32 %s195_s15, 4  ;;  %s30_s18 = sshll.u32 %s196_s17, 4  ;;  %s21_s16 = int_to_ptr.vmem [resolvable:$true] %s20_s16  ;;  %s31_s18 = int_to_ptr.vmem [resolvable:$true] %s30_s18 }
   0x5   :  { %s99_s21 = scalar_lea.hbm %s275_s0, 64 }
   0x6   :  { %p100_p0 = scmp.ne.s32.totalorder %s275_s0, %s99_s21  ;;  %p103_p1 = scmp.lt.u32.totalorder %s99_s21, %s275_s0 }
   0x8   :  { %p105_p2 = pnand %p103_p1, %p100_p0 }
   0xa   :  { %108 = shalt.err (!%p105_p2)
}
   0xb   :  { %s109_s26 = scalar_lea.vmem %s21_s16, 64  ;;  %p114_p4 = scmp.lt.s32.totalorder %s21_s16, %s21_s16 }
   0xc   :  { %p110_p3 = scmp.ne.s32.totalorder %s21_s16, %s109_s26  ;;  %p115_p5 = scmp.lt.s32.totalorder %s109_s26, %s109_s26 }
   0xe   :  { %p116_p6 = por %p115_p5, %p114_p4 }
  0x10   :  { %p117_p7 = pnand %p116_p6, %p110_p3 }
  0x12   :  { %120 = shalt.err (!%p117_p7)
}
  0x13   :  { %23 = dma.hbm_to_vmem [thread:$0]  %s275_s0, 64, %s21_s16, [#allocation3]  }
  0x14   :  { %s121_s5 = scalar_lea.hbm %s276_s1, 64 }
  0x15   :  { %p122_p8 = scmp.ne.s32.totalorder %s276_s1, %s121_s5  ;;  %p125_p9 = scmp.lt.u32.totalorder %s121_s5, %s276_s1 }
  0x17   :  { %p127_p10 = pnand %p125_p9, %p122_p8 }
  0x19   :  { %130 = shalt.err (!%p127_p10)
}
  0x1a   :  { %s131_s10 = scalar_lea.vmem %s31_s18, 64  ;;  %p136_p12 = scmp.lt.s32.totalorder %s31_s18, %s31_s18 }
  0x1b   :  { %p132_p11 = scmp.ne.s32.totalorder %s31_s18, %s131_s10  ;;  %p137_p13 = scmp.lt.s32.totalorder %s131_s10, %s131_s10 }
  0x1d   :  { %p138_p0 = por %p137_p13, %p136_p12 }
  0x1f   :  { %p139_p1 = pnand %p138_p0, %p132_p11 }
  0x21   :  { %142 = shalt.err (!%p139_p1)
}
  0x22   :  { %33 = dma.hbm_to_vmem [thread:$0]  %s276_s1, 64, %s31_s18, [#allocation6]  }
  0x23   :  { %187 = dma.done.wait [#allocation3], 64  }
  0x24   :  { %188 = vsyncadd [#allocation3], 4294967232 }
  0x25   :  { %189 = dma.done.wait [#allocation6], 64  }
  0x26   :  { %190 = vsyncadd [#allocation6], 4294967232  ;;  %v46_v0 = vld [vmem:[%s277_s2] sm:$0xf]  ;;  %v44_v7 = vld [vmem:[#allocation5] sm:$0xf] }
  0x27   :  { %v47_v1 = vunpack.c.l.bf16 %v46_v0  ;;  %v42_v6 = vld [vmem:[#allocation2] sm:$0xf]  ;;  %v45_v9 = vunpack.c.l.bf16 %v44_v7  ;;  %s197_s1 = smov [#allocation7]   ;;  %s198_s15 = smov [#allocation8]  }
  0x28   :  { %v43_v8 = vunpack.c.l.bf16 %v42_v6  ;;  %s67_s14 = sshll.u32 %s197_s1, 4  ;;  %s77_s16 = sshll.u32 %s198_s15, 4  ;;  %s68_s14 = int_to_ptr.vmem [resolvable:$true] %s67_s14  ;;  %s78_s16 = int_to_ptr.vmem [resolvable:$true] %s77_s16 }
  0x29   :  { %v48_v2 = vsub.f32 0.0, %v47_v1  ;;  %s143_s2 = scalar_lea.vmem %s68_s14, 64  ;;  %p148_p3 = scmp.lt.s32.totalorder %s68_s14, %s68_s14 }
  0x2a   :  { %v53_v10 = vsub.f32 %v43_v8, %v45_v9  ;;  %p144_p2 = scmp.ne.s32.totalorder %s68_s14, %s143_s2  ;;  %p149_p4 = scmp.lt.s32.totalorder %s143_s2, %s143_s2 }
  0x2b   :  { %v49_v3 = vmul.f32 1.442695, %v48_v2 }
  0x2c   :  { %p150_p5 = por %p149_p4, %p148_p3 }
  0x2d   :  { %95 = vpow2.f32 %v49_v3 }
  0x2e   :  { %p151_p6 = pnand %p150_p5, %p144_p2 }
  0x37   :  { %v96_v4 = vpop.eup %95 }
  0x38   :  { %v51_v5 = vadd.f32 1.0, %v96_v4 }
  0x3a   :  { %97 = vrcp.f32 %v51_v5 }
  0x44   :  { %v98_v11 = vpop.eup %97 }
  0x45   :  { %v54_v12 = vmul.f32 %v98_v11, %v53_v10 }
  0x47   :  { %v55_v13 = vadd.f32 %v54_v12, %v45_v9 }
  0x49   :  { %v56_v14 = vpack.c.bf16 %v55_v13, %v55_v13  ;;  %v58_v15 = vmul.f32 %v55_v13, %v55_v13 }
  0x4b   :  { %57 = vst [vmem:[#allocation7] sm:$0xf] %v56_v14  ;;  %60 = vst [vmem:[#allocation8] sm:$0xff] %v58_v15 }
  0x4c   :  { %154 = shalt.err (!%p151_p6)
}
  0x4d   :  { %s155_s19 = scalar_lea.hbm %s278_s3, 64 }
  0x4e   :  { %p156_p7 = scmp.ne.s32.totalorder %s278_s3, %s155_s19  ;;  %p159_p8 = scmp.lt.u32.totalorder %s155_s19, %s278_s3 }
  0x50   :  { %p161_p9 = pnand %p159_p8, %p156_p7 }
  0x52   :  { %164 = shalt.err (!%p161_p9)
}
  0x53   :  { %70 = dma.vmem_to_hbm [thread:$0]  %s68_s14, 64, %s278_s3, [#allocation4]  }
  0x54   :  { %s165_s26 = scalar_lea.vmem %s78_s16, 128  ;;  %p170_p11 = scmp.lt.s32.totalorder %s78_s16, %s78_s16 }
  0x55   :  { %p166_p10 = scmp.ne.s32.totalorder %s78_s16, %s165_s26  ;;  %p171_p12 = scmp.lt.s32.totalorder %s165_s26, %s165_s26 }
  0x57   :  { %p172_p13 = por %p171_p12, %p170_p11 }
  0x59   :  { %p173_p0 = pnand %p172_p13, %p166_p10 }
  0x5b   :  { %176 = shalt.err (!%p173_p0)
}
  0x5c   :  { %s177_s29 = scalar_lea.hbm %s279_s4, 128 }
  0x5d   :  { %p178_p1 = scmp.ne.s32.totalorder %s279_s4, %s177_s29  ;;  %p181_p2 = scmp.lt.u32.totalorder %s177_s29, %s279_s4 }
  0x5f   :  { %p183_p3 = pnand %p181_p2, %p178_p1 }
  0x61   :  { %186 = shalt.err (!%p183_p3)
}
  0x62   :  { %80 = dma.vmem_to_hbm [thread:$0]  %s78_s16, 128, %s279_s4, [#allocation9]  }
  0x63   :  { %191 = dma.done.wait [#allocation4], 64  }
  0x64   :  { %192 = vsyncadd [#allocation4], 4294967232 }
  0x65   :  { %193 = dma.done.wait [#allocation9], 128  }
  0x66   :  { %194 = vsyncadd [#allocation9], 4294967168 }
  0x67   :  { %87 = vsyncpa [#allocation3], 1 }
  0x68   :  { %88 = vsyncpa [#allocation6], 1 }
  0x69   :  { %89 = vsyncpa [#allocation4], 1 }
  0x6a   :  { %90 = vsyncpa [#allocation9], 1 }

</bundles_post_ra>
